<compile_context>
chip_gen: v7x
topology: tpu7x:2x2x1
jax: 0.10.0
libtpu: 0.0.40
codegen_flags: <defaults>
</compile_context>

<pallas_src>
import jax
import jax.numpy as jnp
from jax.experimental import pallas as pl
from jax.experimental.pallas import tpu as pltpu


def _make_attention_kernel(num_groups, group_size, head_dim):
    """Build the per-(batch, head_group) kernel; all sizes are static."""
    GH = group_size * head_dim

    def _compute(x_ref, wqkv_ref, wproj_ref, g):
        x = x_ref[0]                                   # (N, C), input dtype
        dt = x.dtype

        # Fused q/k/v projection for every head of this group: one MXU pass
        # over x.  Weights are VMEM-resident; index the group's slab directly.
        qkv = jnp.dot(x, wqkv_ref[g],
                      preferred_element_type=jnp.float32).astype(dt)  # (N, 3*GH)
        qg = qkv[:, 0 * GH:1 * GH]                     # (N, GH)  (scale folded)
        kg = qkv[:, 1 * GH:2 * GH]
        vg = qkv[:, 2 * GH:3 * GH]

        # Per-head attention inside the group (statically unrolled).
        o_parts = []
        for h in range(group_size):
            sl = slice(h * head_dim, (h + 1) * head_dim)
            qh, kh, vh = qg[:, sl], kg[:, sl], vg[:, sl]
            s = jnp.einsum("nd,md->nm", qh, kh,
                           preferred_element_type=jnp.float32)        # (N, N) f32
            m = jnp.max(s, axis=-1, keepdims=True)
            p = jnp.exp(s - m)
            l = jnp.sum(p, axis=-1, keepdims=True)                    # (N, 1)
            # Unnormalized PV matmul, then normalize the narrow (N, hd) result
            # on the EUP (approx reciprocal) instead of scaling (N, N) probs.
            oh = jnp.dot(p.astype(dt), vh,
                         preferred_element_type=jnp.float32)          # (N, hd)
            oh = oh * pl.reciprocal(l, approx=True)
            o_parts.append(oh.astype(dt))
        o_group = jnp.concatenate(o_parts, axis=-1)                   # (N, GH)

        # Fused head-concat + output projection for this group of heads.
        return jnp.dot(o_group, wproj_ref[g],
                       preferred_element_type=jnp.float32)            # (N, C) f32

    if num_groups == 1:
        def kernel(x_ref, wqkv_ref, wproj_ref, bproj_ref, out_ref):
            proj = _compute(x_ref, wqkv_ref, wproj_ref, pl.program_id(1))
            bias = bproj_ref[...].astype(jnp.float32)
            out_ref[0] = (proj + bias).astype(out_ref.dtype)
        return kernel

    def kernel(x_ref, wqkv_ref, wproj_ref, bproj_ref, out_ref, acc_ref):
        g = pl.program_id(1)
        proj = _compute(x_ref, wqkv_ref, wproj_ref, g)

        @pl.when(g == 0)
        def _first():                       # write-direct: no zero-init pass
            acc_ref[...] = proj

        @pl.when(g > 0)
        def _accumulate():
            acc_ref[...] += proj

        @pl.when(g == num_groups - 1)
        def _finalize():
            bias = bproj_ref[...].astype(jnp.float32)
            out_ref[0] = (acc_ref[...] + bias).astype(out_ref.dtype)

    return kernel


def _vmem_limit_bytes(N, C, group_size, head_dim, num_groups, dtype):
    """Honest working-set estimate, capped by the chip's physical VMEM."""
    isz = jnp.dtype(dtype).itemsize
    gh = group_size * head_dim
    resident = 2 * (num_groups * C * 3 * gh + num_groups * gh * C + C) * isz
    streamed = 2 * 2 * N * C * isz                    # x + out, double-buffered
    scratch = 0 if num_groups == 1 else N * C * 4     # f32 accumulator
    temps = (3 * N * gh * (4 + isz)                   # fused qkv (f32 + dt)
             + 2 * N * N * 4                          # scores + exp
             + N * gh * (4 + isz)                     # oh (f32 + dt)
             + 2 * N * C * 4)                         # proj f32 + out staging
    want = int((resident + streamed + scratch + temps) * 1.5) + (8 << 20)
    try:
        phys = getattr(pltpu.get_tpu_info(), "vmem_capacity_bytes", 64 << 20)
    except Exception:
        phys = 64 << 20                               # smallest current gen (v7x)
    cap = int(phys * 0.7)                             # headroom for internal scratch
    return int(min(max(want, 16 << 20), cap))


def prepare_attention_params(w_qkv, w_proj, b_proj, *, num_heads, qk_scale=None,
                             target_lanes=256):
    """One-time parameter prep (hoisted out of the per-forward path).

    w_qkv:  (C, 3C)  pre-transposed qkv weight (y = x @ w_qkv); output columns
                     laid out as [3, num_heads, head_dim] (torch reshape order).
    w_proj: (C, C)   pre-transposed proj weight (y = o @ w_proj).
    b_proj: (1, C)   proj bias.
    """
    C = w_proj.shape[0]
    assert w_qkv.shape == (C, 3 * C)
    assert C % num_heads == 0
    hd = C // num_heads
    scale = qk_scale if qk_scale is not None else hd ** (-0.5)

    # Heads per group: target ~256-lane matmul tiles, G must divide num_heads.
    g = max(1, min(num_heads, target_lanes // max(hd, 1)))
    while num_heads % g != 0:
        g -= 1
    num_groups = num_heads // g
    gh = g * hd

    w = w_qkv.reshape(C, 3, num_heads, hd)
    wq = (w[:, 0].astype(jnp.float32) * scale).astype(w_qkv.dtype)  # fold qk scale
    wk = w[:, 1]
    wv = w[:, 2]

    def group_cols(wx):                               # (C, H, hd) -> (G#, C, gh)
        return wx.reshape(C, num_groups, gh).transpose(1, 0, 2)

    wqkv_g = jnp.concatenate(
        [group_cols(wq), group_cols(wk), group_cols(wv)], axis=-1)  # (G#, C, 3*gh)
    wproj_g = w_proj.reshape(num_groups, gh, C)                     # (G#, gh, C)

    return dict(wqkv=wqkv_g, wproj=wproj_g, bproj=b_proj,
                num_heads=num_heads, num_groups=num_groups,
                group_size=g, head_dim=hd)


def attention_forward(x, params):
    """ViT multi-head self-attention forward (mask=None, dropout = identity)."""
    B, N, C = x.shape
    num_groups = params["num_groups"]
    G = params["group_size"]
    hd = params["head_dim"]
    gh = G * hd

    kernel = _make_attention_kernel(num_groups, G, hd)
    scratch = [] if num_groups == 1 else [pltpu.VMEM((N, C), jnp.float32)]

    return pl.pallas_call(
        kernel,
        out_shape=jax.ShapeDtypeStruct((B, N, C), x.dtype),
        grid_spec=pltpu.PrefetchScalarGridSpec(
            num_scalar_prefetch=0,
            grid=(B, num_groups),
            in_specs=[
                # x: streamed per batch element.
                pl.BlockSpec((1, N, C), lambda b, g: (b, 0, 0)),
                # Weights & bias: full-extent blocks with constant index maps
                # -> DMA'd into VMEM once, resident for the whole grid.
                pl.BlockSpec((num_groups, C, 3 * gh), lambda b, g: (0, 0, 0)),
                pl.BlockSpec((num_groups, gh, C), lambda b, g: (0, 0, 0)),
                pl.BlockSpec((1, C), lambda b, g: (0, 0)),
            ],
            out_specs=pl.BlockSpec((1, N, C), lambda b, g: (b, 0, 0)),
            scratch_shapes=scratch,
        ),
        compiler_params=pltpu.CompilerParams(
            dimension_semantics=("parallel", "arbitrary"),
            vmem_limit_bytes=_vmem_limit_bytes(N, C, G, hd, num_groups, x.dtype),
        ),
    )(x, params["wqkv"], params["wproj"], params["bproj"])


def attention_reference(x, w_qkv, w_proj, b_proj, *, num_heads):
    """Pure-JAX reference mirroring the PyTorch forward (mask=None, no dropout)."""
    B, N, C = x.shape
    head_dim = C // num_heads
    scale = head_dim ** (-0.5)
    qkv = jnp.einsum("bnc,cd->bnd", x, w_qkv)                  # (B, N, 3C)
    qkv = qkv.reshape(B, N, 3, num_heads, head_dim).transpose(2, 0, 3, 1, 4)
    q, k, v = qkv[0], qkv[1], qkv[2]                           # (B, H, N, hd)
    attn = jnp.einsum("bhnd,bhmd->bhnm", q * scale, k)
    attn = jax.nn.softmax(attn, axis=-1)
    o = jnp.einsum("bhnm,bhmd->bhnd", attn, v)
    o = o.transpose(0, 2, 1, 3).reshape(B, N, C)
    return jnp.einsum("bnc,cd->bnd", o, w_proj) + b_proj[0]


if __name__ == "__main__":
    key = jax.random.PRNGKey(0)

    def run_case(B, N, C, H, dtype, atol, rtol, key):
        k1, k2, k3, k4, key = jax.random.split(key, 5)
        x = jax.random.normal(k1, (B, N, C), dtype=jnp.float32)
        w_qkv = jax.random.normal(k2, (C, 3 * C), dtype=jnp.float32) * 0.05
        w_proj = jax.random.normal(k3, (C, C), dtype=jnp.float32) * 0.05
        b_proj = jax.random.normal(k4, (1, C), dtype=jnp.float32) * 0.05

        params = prepare_attention_params(
            w_qkv.astype(dtype), w_proj.astype(dtype), b_proj.astype(dtype),
            num_heads=H)
        out = jax.block_until_ready(attention_forward(x.astype(dtype), params))
        ref = attention_reference(x, w_qkv, w_proj, b_proj, num_heads=H)
        assert out.shape == (B, N, C)
        assert jnp.allclose(out.astype(jnp.float32), ref, atol=atol, rtol=rtol), (
            f"mismatch vs reference: B={B} N={N} C={C} H={H} dtype={dtype}")
        return key

    # Config 1: module-consistent small shapes, f32 (single head-group path).
    key = run_case(2, 8, 32, 8, jnp.float32, 2e-3, 2e-3, key)
    # Config 2: bf16 fast path, group width == 128 lanes (single group).
    key = run_case(2, 64, 128, 8, jnp.bfloat16, 5e-2, 5e-2, key)
    # Config 3: bf16, head_dim=64 -> two head-groups (exercises accumulator).
    key = run_case(2, 128, 512, 8, jnp.bfloat16, 1e-1, 5e-2, key)

    print("KERNEL_OK")
</pallas_src>

<mosaic_0001>
module attributes {stable_mosaic.version = 11 : i64} {
  func.func @kernel(%arg0: i32, %arg1: i32, %arg2: memref<1x8x32xf32, #tpu.memory_space<vmem>>, %arg3: memref<1x32x96xf32, #tpu.memory_space<vmem>>, %arg4: memref<1x32x32xf32, #tpu.memory_space<vmem>>, %arg5: memref<1x32xf32, #tpu.memory_space<vmem>>, %arg6: memref<1x8x32xf32, #tpu.memory_space<vmem>>) attributes {dimension_semantics = [#tpu.dimension_semantics<parallel>, #tpu.dimension_semantics<arbitrary>], iteration_bounds = array<i64: 2, 1>, scalar_prefetch = 0 : i64, scratch_operands = 0 : i64, tpu.core_type = #tpu.core_type<tc>, window_params = [{transform_indices = @transform_0, window_bounds = array<i64: 1, 8, 32>}, {pipeline_mode = #tpu.pipeline_mode<synchronous>, transform_indices = @transform_1, window_bounds = array<i64: 1, 32, 96>}, {pipeline_mode = #tpu.pipeline_mode<synchronous>, transform_indices = @transform_2, window_bounds = array<i64: 1, 32, 32>}, {pipeline_mode = #tpu.pipeline_mode<synchronous>, transform_indices = @transform_3, window_bounds = array<i64: 1, 32>}, {transform_indices = @transform_4, window_bounds = array<i64: 1, 8, 32>}]} {
    %c0 = arith.constant 0 : index
    %c0_0 = arith.constant 0 : index
    %c0_1 = arith.constant 0 : index
    %0 = vector.load %arg2[%c0, %c0_0, %c0_1] : memref<1x8x32xf32, #tpu.memory_space<vmem>>, vector<1x8x32xf32>
    %1 = vector.shape_cast %0 : vector<1x8x32xf32> to vector<8x32xf32>
    %2 = arith.index_cast %arg1 : i32 to index
    %c0_2 = arith.constant 0 : index
    %c0_3 = arith.constant 0 : index
    %3 = vector.load %arg3[%2, %c0_2, %c0_3] : memref<1x32x96xf32, #tpu.memory_space<vmem>>, vector<1x32x96xf32>
    %4 = vector.shape_cast %3 : vector<1x32x96xf32> to vector<32x96xf32>
    %cst = arith.constant dense<0.000000e+00> : vector<8x96xf32>
    %5 = tpu.matmul %1, %4, %cst {dimension_numbers = #tpu.dot_dimension_numbers<[1], [0], [0], [1], [0, 0, 1, 1], [], []>} : vector<8x32xf32>, vector<32x96xf32>, vector<8x96xf32> -> vector<8x96xf32>
    %6 = vector.extract_strided_slice %5 {offsets = [0, 0], sizes = [8, 32], strides = [1, 1]} : vector<8x96xf32> to vector<8x32xf32>
    %7 = vector.extract_strided_slice %5 {offsets = [0, 32], sizes = [8, 32], strides = [1, 1]} : vector<8x96xf32> to vector<8x32xf32>
    %8 = vector.extract_strided_slice %5 {offsets = [0, 64], sizes = [8, 32], strides = [1, 1]} : vector<8x96xf32> to vector<8x32xf32>
    %9 = vector.extract_strided_slice %6 {offsets = [0, 0], sizes = [8, 4], strides = [1, 1]} : vector<8x32xf32> to vector<8x4xf32>
    %10 = vector.extract_strided_slice %7 {offsets = [0, 0], sizes = [8, 4], strides = [1, 1]} : vector<8x32xf32> to vector<8x4xf32>
    %11 = vector.extract_strided_slice %8 {offsets = [0, 0], sizes = [8, 4], strides = [1, 1]} : vector<8x32xf32> to vector<8x4xf32>
    "tpu.trace_start"() <{level = 10 : i32, message = "nd,md->nm"}> : () -> ()
    %cst_4 = arith.constant dense<0.000000e+00> : vector<8x8xf32>
    %12 = tpu.matmul %9, %10, %cst_4 {dimension_numbers = #tpu.dot_dimension_numbers<[1], [1], [0], [0], [0, 0, 1, 0], [], []>} : vector<8x4xf32>, vector<8x4xf32>, vector<8x8xf32> -> vector<8x8xf32>
    "tpu.trace_stop"() : () -> ()
    %cst_5 = arith.constant dense<0xFF800000> : vector<8xf32>
    %13 = vector.multi_reduction <maximumf>, %12, %cst_5 [1] : vector<8x8xf32> to vector<8xf32>
    %14 = vector.shape_cast %13 : vector<8xf32> to vector<8x1xf32>
    %15 = vector.broadcast %14 : vector<8x1xf32> to vector<8x8xf32>
    %16 = arith.subf %12, %15 : vector<8x8xf32>
    %17 = math.exp %16 : vector<8x8xf32>
    %cst_6 = arith.constant dense<0.000000e+00> : vector<8xf32>
    %18 = vector.multi_reduction <add>, %17, %cst_6 [1] : vector<8x8xf32> to vector<8xf32>
    %19 = vector.shape_cast %18 : vector<8xf32> to vector<8x1xf32>
    %cst_7 = arith.constant dense<0.000000e+00> : vector<8x4xf32>
    %20 = tpu.matmul %17, %11, %cst_7 {dimension_numbers = #tpu.dot_dimension_numbers<[1], [0], [0], [1], [0, 0, 1, 1], [], []>} : vector<8x8xf32>, vector<8x4xf32>, vector<8x4xf32> -> vector<8x4xf32>
    %21 = tpu.reciprocal %19 {approx = true} : vector<8x1xf32> -> vector<8x1xf32>
    %22 = vector.broadcast %21 : vector<8x1xf32> to vector<8x4xf32>
    %23 = arith.mulf %20, %22 : vector<8x4xf32>
    %24 = vector.extract_strided_slice %6 {offsets = [0, 4], sizes = [8, 4], strides = [1, 1]} : vector<8x32xf32> to vector<8x4xf32>
    %25 = vector.extract_strided_slice %7 {offsets = [0, 4], sizes = [8, 4], strides = [1, 1]} : vector<8x32xf32> to vector<8x4xf32>
    %26 = vector.extract_strided_slice %8 {offsets = [0, 4], sizes = [8, 4], strides = [1, 1]} : vector<8x32xf32> to vector<8x4xf32>
    "tpu.trace_start"() <{level = 10 : i32, message = "nd,md->nm"}> : () -> ()
    %cst_8 = arith.constant dense<0.000000e+00> : vector<8x8xf32>
    %27 = tpu.matmul %24, %25, %cst_8 {dimension_numbers = #tpu.dot_dimension_numbers<[1], [1], [0], [0], [0, 0, 1, 0], [], []>} : vector<8x4xf32>, vector<8x4xf32>, vector<8x8xf32> -> vector<8x8xf32>
    "tpu.trace_stop"() : () -> ()
    %cst_9 = arith.constant dense<0xFF800000> : vector<8xf32>
    %28 = vector.multi_reduction <maximumf>, %27, %cst_9 [1] : vector<8x8xf32> to vector<8xf32>
    %29 = vector.shape_cast %28 : vector<8xf32> to vector<8x1xf32>
    %30 = vector.broadcast %29 : vector<8x1xf32> to vector<8x8xf32>
    %31 = arith.subf %27, %30 : vector<8x8xf32>
    %32 = math.exp %31 : vector<8x8xf32>
    %cst_10 = arith.constant dense<0.000000e+00> : vector<8xf32>
    %33 = vector.multi_reduction <add>, %32, %cst_10 [1] : vector<8x8xf32> to vector<8xf32>
    %34 = vector.shape_cast %33 : vector<8xf32> to vector<8x1xf32>
    %cst_11 = arith.constant dense<0.000000e+00> : vector<8x4xf32>
    %35 = tpu.matmul %32, %26, %cst_11 {dimension_numbers = #tpu.dot_dimension_numbers<[1], [0], [0], [1], [0, 0, 1, 1], [], []>} : vector<8x8xf32>, vector<8x4xf32>, vector<8x4xf32> -> vector<8x4xf32>
    %36 = tpu.reciprocal %34 {approx = true} : vector<8x1xf32> -> vector<8x1xf32>
    %37 = vector.broadcast %36 : vector<8x1xf32> to vector<8x4xf32>
    %38 = arith.mulf %35, %37 : vector<8x4xf32>
    %39 = vector.extract_strided_slice %6 {offsets = [0, 8], sizes = [8, 4], strides = [1, 1]} : vector<8x32xf32> to vector<8x4xf32>
    %40 = vector.extract_strided_slice %7 {offsets = [0, 8], sizes = [8, 4], strides = [1, 1]} : vector<8x32xf32> to vector<8x4xf32>
    %41 = vector.extract_strided_slice %8 {offsets = [0, 8], sizes = [8, 4], strides = [1, 1]} : vector<8x32xf32> to vector<8x4xf32>
    "tpu.trace_start"() <{level = 10 : i32, message = "nd,md->nm"}> : () -> ()
    %cst_12 = arith.constant dense<0.000000e+00> : vector<8x8xf32>
    %42 = tpu.matmul %39, %40, %cst_12 {dimension_numbers = #tpu.dot_dimension_numbers<[1], [1], [0], [0], [0, 0, 1, 0], [], []>} : vector<8x4xf32>, vector<8x4xf32>, vector<8x8xf32> -> vector<8x8xf32>
    "tpu.trace_stop"() : () -> ()
    %cst_13 = arith.constant dense<0xFF800000> : vector<8xf32>
    %43 = vector.multi_reduction <maximumf>, %42, %cst_13 [1] : vector<8x8xf32> to vector<8xf32>
    %44 = vector.shape_cast %43 : vector<8xf32> to vector<8x1xf32>
    %45 = vector.broadcast %44 : vector<8x1xf32> to vector<8x8xf32>
    %46 = arith.subf %42, %45 : vector<8x8xf32>
    %47 = math.exp %46 : vector<8x8xf32>
    %cst_14 = arith.constant dense<0.000000e+00> : vector<8xf32>
    %48 = vector.multi_reduction <add>, %47, %cst_14 [1] : vector<8x8xf32> to vector<8xf32>
    %49 = vector.shape_cast %48 : vector<8xf32> to vector<8x1xf32>
    %cst_15 = arith.constant dense<0.000000e+00> : vector<8x4xf32>
    %50 = tpu.matmul %47, %41, %cst_15 {dimension_numbers = #tpu.dot_dimension_numbers<[1], [0], [0], [1], [0, 0, 1, 1], [], []>} : vector<8x8xf32>, vector<8x4xf32>, vector<8x4xf32> -> vector<8x4xf32>
    %51 = tpu.reciprocal %49 {approx = true} : vector<8x1xf32> -> vector<8x1xf32>
    %52 = vector.broadcast %51 : vector<8x1xf32> to vector<8x4xf32>
    %53 = arith.mulf %50, %52 : vector<8x4xf32>
    %54 = vector.extract_strided_slice %6 {offsets = [0, 12], sizes = [8, 4], strides = [1, 1]} : vector<8x32xf32> to vector<8x4xf32>
    %55 = vector.extract_strided_slice %7 {offsets = [0, 12], sizes = [8, 4], strides = [1, 1]} : vector<8x32xf32> to vector<8x4xf32>
    %56 = vector.extract_strided_slice %8 {offsets = [0, 12], sizes = [8, 4], strides = [1, 1]} : vector<8x32xf32> to vector<8x4xf32>
    "tpu.trace_start"() <{level = 10 : i32, message = "nd,md->nm"}> : () -> ()
    %cst_16 = arith.constant dense<0.000000e+00> : vector<8x8xf32>
    %57 = tpu.matmul %54, %55, %cst_16 {dimension_numbers = #tpu.dot_dimension_numbers<[1], [1], [0], [0], [0, 0, 1, 0], [], []>} : vector<8x4xf32>, vector<8x4xf32>, vector<8x8xf32> -> vector<8x8xf32>
    "tpu.trace_stop"() : () -> ()
    %cst_17 = arith.constant dense<0xFF800000> : vector<8xf32>
    %58 = vector.multi_reduction <maximumf>, %57, %cst_17 [1] : vector<8x8xf32> to vector<8xf32>
    %59 = vector.shape_cast %58 : vector<8xf32> to vector<8x1xf32>
    %60 = vector.broadcast %59 : vector<8x1xf32> to vector<8x8xf32>
    %61 = arith.subf %57, %60 : vector<8x8xf32>
    %62 = math.exp %61 : vector<8x8xf32>
    %cst_18 = arith.constant dense<0.000000e+00> : vector<8xf32>
    %63 = vector.multi_reduction <add>, %62, %cst_18 [1] : vector<8x8xf32> to vector<8xf32>
    %64 = vector.shape_cast %63 : vector<8xf32> to vector<8x1xf32>
    %cst_19 = arith.constant dense<0.000000e+00> : vector<8x4xf32>
    %65 = tpu.matmul %62, %56, %cst_19 {dimension_numbers = #tpu.dot_dimension_numbers<[1], [0], [0], [1], [0, 0, 1, 1], [], []>} : vector<8x8xf32>, vector<8x4xf32>, vector<8x4xf32> -> vector<8x4xf32>
    %66 = tpu.reciprocal %64 {approx = true} : vector<8x1xf32> -> vector<8x1xf32>
    %67 = vector.broadcast %66 : vector<8x1xf32> to vector<8x4xf32>
    %68 = arith.mulf %65, %67 : vector<8x4xf32>
    %69 = vector.extract_strided_slice %6 {offsets = [0, 16], sizes = [8, 4], strides = [1, 1]} : vector<8x32xf32> to vector<8x4xf32>
    %70 = vector.extract_strided_slice %7 {offsets = [0, 16], sizes = [8, 4], strides = [1, 1]} : vector<8x32xf32> to vector<8x4xf32>
    %71 = vector.extract_strided_slice %8 {offsets = [0, 16], sizes = [8, 4], strides = [1, 1]} : vector<8x32xf32> to vector<8x4xf32>
    "tpu.trace_start"() <{level = 10 : i32, message = "nd,md->nm"}> : () -> ()
    %cst_20 = arith.constant dense<0.000000e+00> : vector<8x8xf32>
    %72 = tpu.matmul %69, %70, %cst_20 {dimension_numbers = #tpu.dot_dimension_numbers<[1], [1], [0], [0], [0, 0, 1, 0], [], []>} : vector<8x4xf32>, vector<8x4xf32>, vector<8x8xf32> -> vector<8x8xf32>
    "tpu.trace_stop"() : () -> ()
    %cst_21 = arith.constant dense<0xFF800000> : vector<8xf32>
    %73 = vector.multi_reduction <maximumf>, %72, %cst_21 [1] : vector<8x8xf32> to vector<8xf32>
    %74 = vector.shape_cast %73 : vector<8xf32> to vector<8x1xf32>
    %75 = vector.broadcast %74 : vector<8x1xf32> to vector<8x8xf32>
    %76 = arith.subf %72, %75 : vector<8x8xf32>
    %77 = math.exp %76 : vector<8x8xf32>
    %cst_22 = arith.constant dense<0.000000e+00> : vector<8xf32>
    %78 = vector.multi_reduction <add>, %77, %cst_22 [1] : vector<8x8xf32> to vector<8xf32>
    %79 = vector.shape_cast %78 : vector<8xf32> to vector<8x1xf32>
    %cst_23 = arith.constant dense<0.000000e+00> : vector<8x4xf32>
    %80 = tpu.matmul %77, %71, %cst_23 {dimension_numbers = #tpu.dot_dimension_numbers<[1], [0], [0], [1], [0, 0, 1, 1], [], []>} : vector<8x8xf32>, vector<8x4xf32>, vector<8x4xf32> -> vector<8x4xf32>
    %81 = tpu.reciprocal %79 {approx = true} : vector<8x1xf32> -> vector<8x1xf32>
    %82 = vector.broadcast %81 : vector<8x1xf32> to vector<8x4xf32>
    %83 = arith.mulf %80, %82 : vector<8x4xf32>
    %84 = vector.extract_strided_slice %6 {offsets = [0, 20], sizes = [8, 4], strides = [1, 1]} : vector<8x32xf32> to vector<8x4xf32>
    %85 = vector.extract_strided_slice %7 {offsets = [0, 20], sizes = [8, 4], strides = [1, 1]} : vector<8x32xf32> to vector<8x4xf32>
    %86 = vector.extract_strided_slice %8 {offsets = [0, 20], sizes = [8, 4], strides = [1, 1]} : vector<8x32xf32> to vector<8x4xf32>
    "tpu.trace_start"() <{level = 10 : i32, message = "nd,md->nm"}> : () -> ()
    %cst_24 = arith.constant dense<0.000000e+00> : vector<8x8xf32>
    %87 = tpu.matmul %84, %85, %cst_24 {dimension_numbers = #tpu.dot_dimension_numbers<[1], [1], [0], [0], [0, 0, 1, 0], [], []>} : vector<8x4xf32>, vector<8x4xf32>, vector<8x8xf32> -> vector<8x8xf32>
    "tpu.trace_stop"() : () -> ()
    %cst_25 = arith.constant dense<0xFF800000> : vector<8xf32>
    %88 = vector.multi_reduction <maximumf>, %87, %cst_25 [1] : vector<8x8xf32> to vector<8xf32>
    %89 = vector.shape_cast %88 : vector<8xf32> to vector<8x1xf32>
    %90 = vector.broadcast %89 : vector<8x1xf32> to vector<8x8xf32>
    %91 = arith.subf %87, %90 : vector<8x8xf32>
    %92 = math.exp %91 : vector<8x8xf32>
    %cst_26 = arith.constant dense<0.000000e+00> : vector<8xf32>
    %93 = vector.multi_reduction <add>, %92, %cst_26 [1] : vector<8x8xf32> to vector<8xf32>
    %94 = vector.shape_cast %93 : vector<8xf32> to vector<8x1xf32>
    %cst_27 = arith.constant dense<0.000000e+00> : vector<8x4xf32>
    %95 = tpu.matmul %92, %86, %cst_27 {dimension_numbers = #tpu.dot_dimension_numbers<[1], [0], [0], [1], [0, 0, 1, 1], [], []>} : vector<8x8xf32>, vector<8x4xf32>, vector<8x4xf32> -> vector<8x4xf32>
    %96 = tpu.reciprocal %94 {approx = true} : vector<8x1xf32> -> vector<8x1xf32>
    %97 = vector.broadcast %96 : vector<8x1xf32> to vector<8x4xf32>
    %98 = arith.mulf %95, %97 : vector<8x4xf32>
    %99 = vector.extract_strided_slice %6 {offsets = [0, 24], sizes = [8, 4], strides = [1, 1]} : vector<8x32xf32> to vector<8x4xf32>
    %100 = vector.extract_strided_slice %7 {offsets = [0, 24], sizes = [8, 4], strides = [1, 1]} : vector<8x32xf32> to vector<8x4xf32>
    %101 = vector.extract_strided_slice %8 {offsets = [0, 24], sizes = [8, 4], strides = [1, 1]} : vector<8x32xf32> to vector<8x4xf32>
    "tpu.trace_start"() <{level = 10 : i32, message = "nd,md->nm"}> : () -> ()
    %cst_28 = arith.constant dense<0.000000e+00> : vector<8x8xf32>
    %102 = tpu.matmul %99, %100, %cst_28 {dimension_numbers = #tpu.dot_dimension_numbers<[1], [1], [0], [0], [0, 0, 1, 0], [], []>} : vector<8x4xf32>, vector<8x4xf32>, vector<8x8xf32> -> vector<8x8xf32>
    "tpu.trace_stop"() : () -> ()
    %cst_29 = arith.constant dense<0xFF800000> : vector<8xf32>
    %103 = vector.multi_reduction <maximumf>, %102, %cst_29 [1] : vector<8x8xf32> to vector<8xf32>
    %104 = vector.shape_cast %103 : vector<8xf32> to vector<8x1xf32>
    %105 = vector.broadcast %104 : vector<8x1xf32> to vector<8x8xf32>
    %106 = arith.subf %102, %105 : vector<8x8xf32>
    %107 = math.exp %106 : vector<8x8xf32>
    %cst_30 = arith.constant dense<0.000000e+00> : vector<8xf32>
    %108 = vector.multi_reduction <add>, %107, %cst_30 [1] : vector<8x8xf32> to vector<8xf32>
    %109 = vector.shape_cast %108 : vector<8xf32> to vector<8x1xf32>
    %cst_31 = arith.constant dense<0.000000e+00> : vector<8x4xf32>
    %110 = tpu.matmul %107, %101, %cst_31 {dimension_numbers = #tpu.dot_dimension_numbers<[1], [0], [0], [1], [0, 0, 1, 1], [], []>} : vector<8x8xf32>, vector<8x4xf32>, vector<8x4xf32> -> vector<8x4xf32>
    %111 = tpu.reciprocal %109 {approx = true} : vector<8x1xf32> -> vector<8x1xf32>
    %112 = vector.broadcast %111 : vector<8x1xf32> to vector<8x4xf32>
    %113 = arith.mulf %110, %112 : vector<8x4xf32>
    %114 = vector.extract_strided_slice %6 {offsets = [0, 28], sizes = [8, 4], strides = [1, 1]} : vector<8x32xf32> to vector<8x4xf32>
    %115 = vector.extract_strided_slice %7 {offsets = [0, 28], sizes = [8, 4], strides = [1, 1]} : vector<8x32xf32> to vector<8x4xf32>
    %116 = vector.extract_strided_slice %8 {offsets = [0, 28], sizes = [8, 4], strides = [1, 1]} : vector<8x32xf32> to vector<8x4xf32>
    "tpu.trace_start"() <{level = 10 : i32, message = "nd,md->nm"}> : () -> ()
    %cst_32 = arith.constant dense<0.000000e+00> : vector<8x8xf32>
    %117 = tpu.matmul %114, %115, %cst_32 {dimension_numbers = #tpu.dot_dimension_numbers<[1], [1], [0], [0], [0, 0, 1, 0], [], []>} : vector<8x4xf32>, vector<8x4xf32>, vector<8x8xf32> -> vector<8x8xf32>
    "tpu.trace_stop"() : () -> ()
    %cst_33 = arith.constant dense<0xFF800000> : vector<8xf32>
    %118 = vector.multi_reduction <maximumf>, %117, %cst_33 [1] : vector<8x8xf32> to vector<8xf32>
    %119 = vector.shape_cast %118 : vector<8xf32> to vector<8x1xf32>
    %120 = vector.broadcast %119 : vector<8x1xf32> to vector<8x8xf32>
    %121 = arith.subf %117, %120 : vector<8x8xf32>
    %122 = math.exp %121 : vector<8x8xf32>
    %cst_34 = arith.constant dense<0.000000e+00> : vector<8xf32>
    %123 = vector.multi_reduction <add>, %122, %cst_34 [1] : vector<8x8xf32> to vector<8xf32>
    %124 = vector.shape_cast %123 : vector<8xf32> to vector<8x1xf32>
    %cst_35 = arith.constant dense<0.000000e+00> : vector<8x4xf32>
    %125 = tpu.matmul %122, %116, %cst_35 {dimension_numbers = #tpu.dot_dimension_numbers<[1], [0], [0], [1], [0, 0, 1, 1], [], []>} : vector<8x8xf32>, vector<8x4xf32>, vector<8x4xf32> -> vector<8x4xf32>
    %126 = tpu.reciprocal %124 {approx = true} : vector<8x1xf32> -> vector<8x1xf32>
    %127 = vector.broadcast %126 : vector<8x1xf32> to vector<8x4xf32>
    %128 = arith.mulf %125, %127 : vector<8x4xf32>
    %129 = tpu.concatenate %23, %38, %53, %68, %83, %98, %113, %128 in 1 : vector<8x4xf32>, vector<8x4xf32>, vector<8x4xf32>, vector<8x4xf32>, vector<8x4xf32>, vector<8x4xf32>, vector<8x4xf32>, vector<8x4xf32> -> vector<8x32xf32>
    %130 = arith.index_cast %arg1 : i32 to index
    %c0_36 = arith.constant 0 : index
    %c0_37 = arith.constant 0 : index
    %131 = vector.load %arg4[%130, %c0_36, %c0_37] : memref<1x32x32xf32, #tpu.memory_space<vmem>>, vector<1x32x32xf32>
    %132 = vector.shape_cast %131 : vector<1x32x32xf32> to vector<32x32xf32>
    %cst_38 = arith.constant dense<0.000000e+00> : vector<8x32xf32>
    %133 = tpu.matmul %129, %132, %cst_38 {dimension_numbers = #tpu.dot_dimension_numbers<[1], [0], [0], [1], [0, 0, 1, 1], [], []>} : vector<8x32xf32>, vector<32x32xf32>, vector<8x32xf32> -> vector<8x32xf32>
    %c0_39 = arith.constant 0 : index
    %c0_40 = arith.constant 0 : index
    %134 = vector.load %arg5[%c0_39, %c0_40] : memref<1x32xf32, #tpu.memory_space<vmem>>, vector<1x32xf32>
    %135 = vector.broadcast %134 : vector<1x32xf32> to vector<8x32xf32>
    %136 = arith.addf %133, %135 : vector<8x32xf32>
    %c0_41 = arith.constant 0 : index
    %c0_42 = arith.constant 0 : index
    %c0_43 = arith.constant 0 : index
    %137 = vector.load %arg6[%c0_41, %c0_42, %c0_43] : memref<1x8x32xf32, #tpu.memory_space<vmem>>, vector<1x8x32xf32>
    %138 = vector.shape_cast %137 : vector<1x8x32xf32> to vector<8x32xf32>
    %139 = vector.shape_cast %136 : vector<8x32xf32> to vector<1x8x32xf32>
    tpu.vector_store %arg6[%c0_41, %c0_42, %c0_43], %139 {strides = array<i32>} : memref<1x8x32xf32, #tpu.memory_space<vmem>>, vector<1x8x32xf32>,
    return
  }
  func.func @transform_0(%arg0: i32, %arg1: i32) -> (i32, i32, i32) {
    %c0_i32 = arith.constant 0 : i32
    %c0_i32_0 = arith.constant 0 : i32
    %c0_i32_1 = arith.constant 0 : i32
    return %arg0, %c0_i32, %c0_i32_0 : i32, i32, i32
  }
  func.func @transform_1(%arg0: i32, %arg1: i32) -> (i32, i32, i32) {
    %c0_i32 = arith.constant 0 : i32
    %c0_i32_0 = arith.constant 0 : i32
    %c0_i32_1 = arith.constant 0 : i32
    %c0_i32_2 = arith.constant 0 : i32
    return %c0_i32, %c0_i32_0, %c0_i32_1 : i32, i32, i32
  }
  func.func @transform_2(%arg0: i32, %arg1: i32) -> (i32, i32, i32) {
    %c0_i32 = arith.constant 0 : i32
    %c0_i32_0 = arith.constant 0 : i32
    %c0_i32_1 = arith.constant 0 : i32
    %c0_i32_2 = arith.constant 0 : i32
    return %c0_i32, %c0_i32_0, %c0_i32_1 : i32, i32, i32
  }
  func.func @transform_3(%arg0: i32, %arg1: i32) -> (i32, i32) {
    %c0_i32 = arith.constant 0 : i32
    %c0_i32_0 = arith.constant 0 : i32
    %c0_i32_1 = arith.constant 0 : i32
    return %c0_i32, %c0_i32_0 : i32, i32
  }
  func.func @transform_4(%arg0: i32, %arg1: i32) -> (i32, i32, i32) {
    %c0_i32 = arith.constant 0 : i32
    %c0_i32_0 = arith.constant 0 : i32
    %c0_i32_1 = arith.constant 0 : i32
    return %arg0, %c0_i32, %c0_i32_0 : i32, i32, i32
  }
}

</mosaic_0001>

<bundles_post_ra>
// kernel: tpu_custom_call.1
= control target key start
LH: loop header
LB: loop body
LE: loop exit
PB: predicated region body
PF: predicated region fallthrough
CT: control target
= control target key end

     0   :  { %9 = vsyncpa [#allocation3], 0  ;;  %s2894_s0 = inlined_call_operand.hbm [shape: f32[2,8,32], index: 0, kind: input, shape index: {}]   ;;  %s2895_s1 = inlined_call_operand.hbm [shape: f32[1,32,96], index: 1, kind: input, shape index: {}]   ;;  %s2896_s2 = inlined_call_operand.hbm [shape: f32[1,32,32], index: 2, kind: input, shape index: {}]   ;;  %s2897_s3 = inlined_call_operand.vmem [shape: f32[1,32], index: 3, kind: input, shape index: {}]   ;;  %s2898_s4 = inlined_call_operand.hbm [shape: f32[2,8,32], index: 4, kind: output, shape index: {}]  }
   0x1   :  { %11 = vsyncpa [#allocation3 + $0x1], 0 }
   0x2   :  { %12 = vsyncpa [#allocation6], 0 }
   0x3   :  { %13 = vsyncpa [#allocation4], 0 }
   0x4   :  { %15 = vsyncpa [#allocation4 + $0x1], 0  ;;  %s2485_s15 = smov 0   ;;  %s2487_s16 = smov 0  }
   0x5   :  { %s2489_s17 = smov 0   ;;  %s2491_s18 = smov 0  }
   0x6   :  { %s2493_s19 = smov 0   ;;  %s2495_s20 = smov 0  }
   0x7 LB: > { %s1897_s21 = sadd.s32 4294967295, %s2419_s20   ;;  %s1898_s22 = sadd.s32 4294967294, %s2419_s20   ;;  %s2419_s20 = sphi %s2495_s20, %s21_s20   ;;  %s2415_s19 = sphi %s2493_s19, %s2920_s19   ;;  %s2411_s18 = sphi %s2491_s18, %s2919_s18   ;;  %s2407_s17 = sphi %s2489_s17, %s2918_s17   ;;  %s2403_s16 = sphi %s2487_s16, %s2917_s16   ;;  %s2399_s15 = sphi %s2485_s15, %s2916_s15  }
   0x8   : > { %p53_p0 = scmp.ne.s32.totalorder %s2403_s16, %s2399_s15  ;;  %p2519_p1 = scmp.eq.s32.totalorder %s1897_s21, 0 }
   0x9   : > { %p2523_p2 = scmp.eq.s32.totalorder %s1897_s21, 1  ;;  %p146_p3 = scmp.eq.s32.totalorder %s1898_s22, 1 }
   0xa   : > { %s2903_s23 = scalar_select %p2519_p1, 1, 0 }
   0xb   : > { %p2529_p4 = por %p2519_p1, %p53_p0  ;;  %p1899_p5 = scmp.ge.s32.totalorder %s2419_s20, 1 }
   0xc   : > { %p2534_p6 = por %p146_p3, %p53_p0  ;;  %p153_p7 = scmp.lt.s32.totalorder %s2419_s20, 3 }
   0xd   : > { %s2905_s25 = scalar_select %p2529_p4, 1, 0 }
   0xe   : > { %s2906_s26 = scalar_select %p2534_p6, 1, 0 }
   0xf   : > { %p2539_p8 = pnand %p1899_p5, %p153_p7  ;;  %s2421_s28 = smov [#allocation5]  }
  0x10   : > { %s165_s29 = sshll.u32 %s2421_s28, 4  ;;  %s2422_s5 = smov [#allocation7]   ;;  %s2543_s29 = int_to_ptr.vmem [resolvable:$true] %s165_s29 }
  0x11   : > { %p2109_p9 = pneg %p2539_p8  ;;  %s178_s6 = sshll.u32 %s2422_s5, 4  ;;  %s2554_s6 = int_to_ptr.vmem [resolvable:$true] %s178_s6 }
  0x12   : > { %s2247_s9 = scalar_lea.hbm %s2895_s1, 512 }
  0x13   : > { %p2550_p11 = pnand %p2109_p9, %p2519_p1  ;;  %p2248_p12 = scmp.ne.s32.totalorder %s2895_s1, %s2247_s9 }
  0x14   : > { %p2254_p5 = scmp.lt.u32.totalorder %s2247_s9, %s2895_s1 }
  0x15   : > { %p2249_p13 = pneg %p2550_p11 }
  0x17   : > { %p2250_p0 = pnand %p2249_p13, %p2248_p12 }
  0x19   : > { %p2251_p3 = pneg %p2250_p0 }
  0x1b   : > { %p2256_p7 = pnand %p2254_p5, %p2251_p3 }
  0x1d   : > { %2259 = shalt.err (!%p2256_p7)
}
  0x1e   : > { %s2260_s14 = scalar_lea.vmem %s2543_s29, 512  ;;  %p2268_p1 = scmp.lt.s32.totalorder %s2543_s29, %s2543_s29 }
  0x1f   : > { %p2261_p9 = scmp.ne.s32.totalorder %s2543_s29, %s2260_s14  ;;  %p2269_p12 = scmp.lt.s32.totalorder %s2260_s14, %s2260_s14 }
  0x21   : > { %p2263_p10 = pnand %p2261_p9, %p2249_p13  ;;  %p2270_p0 = por %p2269_p12, %p2268_p1 }
  0x23   : > { %p2264_p6 = pneg %p2263_p10 }
  0x25   : > { %p2271_p4 = pnand %p2270_p0, %p2264_p6 }
  0x27   : > { %2274 = shalt.err (!%p2271_p4)
}
  0x28   : > { %s2423_s21 = smov 128   ;;  %s2424_s22 = smov 8  }
  0x29   : > { %2112 = dma.hbm_to_vmem [thread:$0]  (!%p2550_p11), %s2895_s1, 512, %s2543_s29, [#allocation6], %s2423_s21, %s2423_s21, %s2424_s22  }
  0x2a   : > { %s2275_s9 = scalar_lea.hbm %s2896_s2, 512 }
  0x2b   : > { %p2276_p1 = scmp.ne.s32.totalorder %s2896_s2, %s2275_s9  ;;  %p2282_p10 = scmp.lt.u32.totalorder %s2275_s9, %s2896_s2 }
  0x2d   : > { %p2278_p4 = pnand %p2276_p1, %p2249_p13 }
  0x2f   : > { %p2279_p6 = pneg %p2278_p4 }
  0x31   : > { %p2284_p3 = pnand %p2282_p10, %p2279_p6 }
  0x33   : > { %2287 = shalt.err (!%p2284_p3)
}
  0x34   : > { %s2288_s29 = scalar_lea.vmem %s2554_s6, 512  ;;  %p2296_p12 = scmp.lt.s32.totalorder %s2554_s6, %s2554_s6 }
  0x35   : > { %p2289_p5 = scmp.ne.s32.totalorder %s2554_s6, %s2288_s29  ;;  %p2297_p0 = scmp.lt.s32.totalorder %s2288_s29, %s2288_s29 }
  0x37   : > { %p2291_p7 = pnand %p2289_p5, %p2249_p13  ;;  %p2298_p1 = por %p2297_p0, %p2296_p12 }
  0x39   : > { %p2292_p9 = pneg %p2291_p7 }
  0x3b   : > { %p2299_p4 = pnand %p2298_p1, %p2292_p9 }
  0x3d   : > { %2302 = shalt.err (!%p2299_p4)
}
  0x3e   : > { %2115 = dma.hbm_to_vmem [thread:$0]  (!%p2550_p11), %s2896_s2, 512, %s2554_s6, [#allocation6], %s2423_s21, %s2423_s21, %s2424_s22  }
  0x3f   : > { %s33_s5 = sadd.s32 1, %s2415_s19  ;;  %s40_s7 = sadd.s32 1, %s2407_s17 }
  0x40   : > { %p35_p13 = scmp.ge.s32.totalorder %s33_s5, 2  ;;  %p47_p6 = scmp.ne.s32.totalorder %s2407_s17, %s2403_s16 }
  0x41   : > { %p48_p10 = scmp.eq.s32.totalorder %s2419_s20, 0  ;;  %p2126_p3 = scmp.lt.s32.totalorder %s2419_s20, 2 }
  0x42   : > { %s2922_s5 = smov (%p35_p13, %s33_s5), 0  ;;  %p2618_p7 = por %p2523_p2, %p47_p6 }
  0x43   : > { %p49_p5 = por %p48_p10, %p47_p6  ;;  %s37_s8 = ssub.s32 %s2415_s19, %s2922_s5 }
  0x44   : > { %s2909_s30 = scalar_select %p2618_p7, 1, 0 }
  0x45   : > { %s195_s9 = sand.u32 1, %s2407_s17   ;;  %p38_p9 = scmp.eq.s32.totalorder %s37_s8, 0 }
  0x46   : > { %s1903_s6 = sshll.u32 %s195_s9, 3  ;;  %s1904_s21 = sshll.u32 %s2415_s19, 7 }
  0x47   : > { %s2627_s22 = scalar_select %p38_p9, %s2407_s17, %s40_s7  }
  0x48   : > { %s2632_s12 = scalar_lea.hbm %s2894_s0, %s1904_s21  ;;  %s199_s24 = scalar_lea.vmem [#allocation2], %s1903_s6 }
  0x49   : > { %s206_s13 = sshll.u32 %s199_s24, 4  ;;  %p2636_p2 = pnand %p2126_p3, %p49_p5  ;;  %s2640_s13 = int_to_ptr.vmem [resolvable:$true] %s206_s13 }
  0x4a   : > { %s196_s14 = scalar_lea.sflag [#allocation3], %s195_s9  ;;  %s2303_s28 = scalar_lea.hbm %s2632_s12, 128 }
  0x4b   : > { %p2304_p11 = scmp.ne.s32.totalorder %s2632_s12, %s2303_s28  ;;  %p2305_p12 = pneg %p2636_p2 }
  0x4c   : > { %s2308_s6 = scalar_lea.hbm %s2894_s0, 256  ;;  %p2309_p4 = scmp.lt.u32.totalorder %s2632_s12, %s2894_s0 }
  0x4d   : > { %p2306_p0 = pnand %p2305_p12, %p2304_p11  ;;  %p2310_p13 = scmp.lt.u32.totalorder %s2308_s6, %s2303_s28 }
  0x4e   : > { %p2312_p10 = scmp.lt.u32.totalorder %s2303_s28, %s2632_s12 }
  0x4f   : > { %p2307_p1 = pneg %p2306_p0  ;;  %p2311_p6 = por %p2310_p13, %p2309_p4 }
  0x51   : > { %p2313_p3 = por %p2312_p10, %p2311_p6 }
  0x53   : > { %p2314_p5 = pnand %p2313_p3, %p2307_p1 }
  0x55   : > { %2317 = shalt.err (!%p2314_p5)
}
  0x56   : > { %s2318_s9 = scalar_lea.vmem %s2640_s13, 128  ;;  %s2425_s11 = smov [#allocation2]  }
  0x57   : > { %p2319_p9 = scmp.ne.s32.totalorder %s2640_s13, %s2318_s9  ;;  %s2323_s24 = sshll.u32 %s2425_s11, 4  ;;  %s2324_s24 = int_to_ptr.vmem [resolvable:$false] %s2323_s24 }
  0x58   : > { %s2325_s7 = scalar_lea.vmem %s2324_s24, 256  ;;  %p2326_p7 = scmp.lt.s32.totalorder %s2640_s13, %s2324_s24 }
  0x59   : > { %p2321_p11 = pnand %p2319_p9, %p2305_p12  ;;  %p2327_p4 = scmp.lt.s32.totalorder %s2325_s7, %s2318_s9 }
  0x5b   : > { %p2322_p0 = pneg %p2321_p11  ;;  %p2328_p13 = por %p2327_p4, %p2326_p7 }
  0x5d   : > { %p2329_p6 = pnand %p2328_p13, %p2322_p0 }
  0x5f   : > { %2332 = shalt.err (!%p2329_p6)
}
  0x60   : > { %2119 = dma.hbm_to_vmem [thread:$0]  (!%p2636_p2), %s2632_s12, 128, %s2640_s13, %s196_s14  }
  0x61   : > { %215 = sbr.rel (%p2539_p8) target bundleno = 1775 (0x6ef), region = 36  ;;  %s2670_s28 = sand.u32 (!%p2539_p8), 1, %s2403_s16  }
  0x62   : > { %s1906_s8 = sshll.u32 (!%p2539_p8), %s2670_s28, 3  ;;  %s218_s6 = scalar_lea.sflag (!%p2539_p8), [#allocation3], %s2670_s28 }
  0x63   : > { %s221_s21 = scalar_lea.vmem (!%p2539_p8), [#allocation2], %s1906_s8  ;;  %p2911_p7 = scmp.ne.s32.totalorder (!%p2539_p8), %s2905_s25, 0 }
  0x68   : > { %2386 = dma.done.wait (%p2911_p7), %s218_s6, 128  }
  0x69   : > { %2388 = vsyncadd (%p2911_p7), %s218_s6, 4294967168  ;;  %p2912_p2 = scmp.ne.s32.totalorder %s2903_s23, 0 }
  0x6b   : > { %2390 = dma.done.wait (%p2912_p2), [#allocation6], 1024  }
  0x6c   : > { %2392 = vsyncadd (%p2912_p2), [#allocation6], 4294966272  ;;  %v2426_v0 = vmov 0.0|0.0   ;;  %vm2427_vm0 = vmmov 0   ;;  %v2428_v1 = vmov 0.0   ;;  %v257_v2 = vld [vmem:[#allocation5] sm:$0xff] }
  0x6d   : > { %2085 = vmatprep.subr.bf16.mxu0 %v2426_v0  ;;  %1991 = vmatprep.mubr.msk.f32.mxu0 %vm2427_vm0, %v2428_v1  ;;  %v258_v3 = vld [vmem:[#allocation5 + $0x8] sm:$0xff]  ;;  %v259_v4 = vld [vmem:[#allocation5 + $0x10] sm:$0xff]  ;;  %v260_v6 = vld [vmem:[#allocation5 + $0x18] sm:$0xff]  ;;  %vm261_vm1 = vcmask 261120   ;;  %s2429_s23 = smov 64   ;;  %s2430_s25 = smov 96  }
  0x6e   : > { %1994 = vmatprep.subr.mxu1 %v2428_v1  ;;  %1996 = vmatprep.mubr.msk.f32.mxu1 %vm2427_vm0, %v2428_v1  ;;  %v2086_v5 = vpack.c.bf16 %v258_v3, %v257_v2  ;;  %v2089_v7 = vpack.c.bf16 %v260_v6, %v259_v4  ;;  %v254_v8 = vld [vmem:[%s221_s21] sm:$0xff]  ;;  %s2431_s27 = smov 92   ;;  %s2432_s12 = smov 124   ;;  %vm338_vm2 = vcmask 31744   ;;  %vm413_vm3 = vcmask 64512  }
  0x6f   : > { %s2433_s13 = smov 88   ;;  %s2434_s29 = smov 120   ;;  %vm1686_vm4 = vcmask 97280   ;;  %vm1688_vm5 = vcmask 130048   ;;  %vm1690_vm6 = vcmask 162816   ;;  %vm1692_vm7 = vcmask 195584  }
  0x70   : > { %2087 = vmatpush3.bf16.msra.mxu0 %v2086_v5  ;;  %s2435_s14 = smov 84   ;;  %s2436_s10 = smov 116   ;;  %vm1694_vm8 = vcmask 228352  }
  0x71   : > { %2088 = vmatprep.subr.bf16.mxu0 %v2426_v0  ;;  %s2437_s9 = smov 80   ;;  %s2438_s11 = smov 112  }
  0x72   : > { %s2439_s24 = smov 108   ;;  %s2440_s7 = smov 72  }
  0x73   : > { %s2441_s6 = smov 104   ;;  %s2442_s21 = smov 68  }
  0x74   : > { %2090 = vmatpush3.bf16.msra.mxu0 %v2089_v7  ;;  %p2913_p12 = scmp.ne.s32.totalorder %s2909_s30, 0 }
  0x75   : > { %2014 = vmatprep.subr.mxu0 %v2428_v1 }
  0x77   : > { %1992 = vmatmul.mubr.msk.f32.vlgmr.msra.gmra.mrb[0].mxu0 %vm261_vm1, %v254_v8 }
  0x78   : > { %2016 = vmatprep.mubr.msk.f32.mxu0 %vm2427_vm0, %v2428_v1 }
 0x14a   : > { %v2695_v9 = vpop.f32.mrb[0].mxu0 }
 0x14b   : > { %423 = vrot.lane.b32.xlu1 %v2695_v9, %s2429_s23  ;;  %336 = vrot.lane.b32.xlu0 %v2695_v9, %s2430_s25  ;;  %v1993_v10 = vpop.f32.mrb[1].mxu0  ;;  %s2443_s23 = smov 100   ;;  %s2444_s25 = smov 56  }
 0x14f   : > { %503 = vrot.lane.b32.xlu1 %v2695_v9, %s2431_s27  ;;  %s2445_s27 = smov 76  }
 0x153   : > { %501 = vrot.lane.b32.xlu1 %v2695_v9, %s2432_s12  ;;  %s2446_s12 = smov 60  }
 0x157   : > { %668 = vrot.lane.b32.xlu1 %v2695_v9, %s2433_s13  ;;  %s2447_s13 = smov 44  }
 0x15b   : > { %666 = vrot.lane.b32.xlu1 %v2695_v9, %s2434_s29  ;;  %s2448_s29 = smov 52  }
 0x15f   : > { %833 = vrot.lane.b32.xlu1 %v2695_v9, %s2435_s14  ;;  %s2449_s14 = smov 36  }
 0x163   : > { %831 = vrot.lane.b32.xlu1 %v2695_v9, %s2436_s10  ;;  %s2450_s10 = smov 48  }
 0x167   : > { %998 = vrot.lane.b32.xlu1 %v2695_v9, %s2437_s9  ;;  %s2451_s9 = smov 40  }
 0x16b   : > { %996 = vrot.lane.b32.xlu1 %v2695_v9, %s2438_s11  ;;  %s2452_s11 = smov 4  }
 0x16f   : > { %1161 = vrot.lane.b32.xlu1 %v2695_v9, %s2439_s24  ;;  %s2453_s24 = smov 8  }
 0x173   : > { %1328 = vrot.lane.b32.xlu1 %v2695_v9, %s2440_s7  ;;  %s2454_s7 = smov 12  }
 0x177   : > { %1326 = vrot.lane.b32.xlu1 %v2695_v9, %s2441_s6  ;;  %s2455_s6 = smov 16  }
 0x17b   : > { %1493 = vrot.lane.b32.xlu1 %v2695_v9, %s2442_s21  ;;  %s2456_s21 = smov 20  }
 0x17f   : > { %1491 = vrot.lane.b32.xlu1 %v2695_v9, %s2443_s23  ;;  %s2457_s23 = smov 24  }
 0x183   : > { %753 = vrot.lane.b32.xlu1 %v2695_v9, %s2444_s25  ;;  %s2458_s25 = smov 28  }
 0x1bd   : > { %v424_v11 = vpop.permute.xlu1 %423  ;;  %v337_v12 = vpop.permute.xlu0 %336 }
 0x1be   : > { %1995 = vmatpush3.xpose.msk.msra.mxu1 %vm338_vm2, %v337_v12 }
 0x1bf   : > { %1999 = vmatprep.subr.mxu1 %v2428_v1 }
 0x1c1   : > { %v2715_v13 = vpop.permute.xlu1 %503  ;;  %1997 = vmatmul.mubr.msk.f32.vlgmr.msra.gmra.mrb[0].mxu1 %vm338_vm2, %v2695_v9 }
 0x1c2   : > { %2000 = vmatpush3.msra.mxu1 %v424_v11  ;;  %2001 = vmatprep.mubr.msk.f32.mxu1 %vm2427_vm0, %v2428_v1 }
 0x1c3   : > { %2004 = vmatprep.subr.mxu1 %v2428_v1 }
 0x1c5   : > { %v2722_v14 = vpop.permute.xlu1 %501 }
 0x1c9   : > { %v669_v15 = vpop.permute.xlu1 %668 }
 0x1ca   : > { %2015 = vmatpush3.xpose.msk.msra.mxu0 %vm338_vm2, %v669_v15 }
 0x1cb   : > { %2024 = vmatprep.subr.mxu0 %v2428_v1 }
 0x1cd   : > { %v667_v16 = vpop.permute.xlu1 %666 }
 0x1ce   : > { %2017 = vmatmul.mubr.msk.f32.vlgmr.msra.gmra.mrb[2].mxu0 %vm338_vm2, %v667_v16 }
 0x1cf   : > { %2026 = vmatprep.mubr.msk.f32.mxu0 %vm2427_vm0, %v2428_v1 }
 0x1d1   : > { %v834_v17 = vpop.permute.xlu1 %833 }
 0x1d2   : > { %2025 = vmatpush3.xpose.msk.msra.mxu0 %vm338_vm2, %v834_v17 }
 0x1d3   : > { %2034 = vmatprep.subr.mxu0 %v2428_v1 }
 0x1d5   : > { %v832_v18 = vpop.permute.xlu1 %831 }
 0x1d6   : > { %2027 = vmatmul.mubr.msk.f32.vlgmr.msra.gmra.mrb[4].mxu0 %vm338_vm2, %v832_v18 }
 0x1d7   : > { %2036 = vmatprep.mubr.msk.f32.mxu0 %vm2427_vm0, %v2428_v1 }
 0x1d9   : > { %v999_v19 = vpop.permute.xlu1 %998 }
 0x1da   : > { %2035 = vmatpush3.xpose.msk.msra.mxu0 %vm338_vm2, %v999_v19 }
 0x1db   : > { %2044 = vmatprep.subr.mxu0 %v2428_v1 }
 0x1dd   : > { %v997_v20 = vpop.permute.xlu1 %996 }
 0x1de   : > { %2037 = vmatmul.mubr.msk.f32.vlgmr.msra.gmra.mrb[6].mxu0 %vm338_vm2, %v997_v20 }
 0x1df   : > { %2046 = vmatprep.mubr.msk.f32.mxu0 %vm2427_vm0, %v2428_v1 }
 0x1e1   : > { %v1162_v33 = vpop.permute.xlu1 %1161 }
 0x1e5   : > { %v1329_v34 = vpop.permute.xlu1 %1328 }
 0x1e9   : > { %v1327_v37 = vpop.permute.xlu1 %1326 }
 0x1ed   : > { %v1494_v40 = vpop.permute.xlu1 %1493 }
 0x1f1   : > { %v1492_v42 = vpop.permute.xlu1 %1491 }
 0x1f5   : > { %v754_v11 = vpop.permute.xlu1 %753 }
 0x294   : > { %v409_v21 = vpop.f32.mrb[0].mxu1 }
 0x295   : > { %v1998_v22 = vpop.f32.mrb[1].mxu1  ;;  %v414_v23 = vsel %vm413_vm3, %v409_v21, -inf }
 0x296   : > { %415 = vmax.xlane.f32.xlu0 %v414_v23 }
 0x2a1   : > { %v2740_v24 = vpop.f32.mrb[2].mxu0 }
 0x2a2   : > { %v2018_v25 = vpop.f32.mrb[3].mxu0  ;;  %v744_v30 = vsel %vm413_vm3, %v2740_v24, -inf }
 0x2a9   : > { %v2742_v26 = vpop.f32.mrb[4].mxu0 }
 0x2aa   : > { %v2028_v27 = vpop.f32.mrb[5].mxu0  ;;  %v909_v31 = vsel %vm413_vm3, %v2742_v26, -inf }
 0x2ac   : > { %1163 = vrot.lane.b32.xlu0 %v2695_v9, %s2445_s27 }
 0x2b0   : > { %588 = vrot.lane.b32.xlu0 %v2695_v9, %s2446_s12 }
 0x2b1   : > { %v2746_v28 = vpop.f32.mrb[6].mxu0 }
 0x2b2   : > { %v2038_v29 = vpop.f32.mrb[7].mxu0  ;;  %v1074_v32 = vsel %vm413_vm3, %v2746_v28, -inf }
 0x2cf   : > { %745 = vmax.xlane.f32.xlu0 %v744_v30 }
 0x2d3   : > { %910 = vmax.xlane.f32.xlu0 %v909_v31 }
 0x2d7   : > { %1075 = vmax.xlane.f32.xlu0 %v1074_v32 }
 0x323   : > { %v416_v35 = vpop.xlane.xlu0 %415 }
 0x324   : > { %v417_v36 = vsub.f32 %v409_v21, %v416_v35 }
 0x326   : > { %v418_v38 = vmul.f32 1.442695, %v417_v36 }
 0x327   : > { %v1164_v39 = vpop.permute.xlu0 %1163 }
 0x328   : > { %2215 = vpow2.f32 %v418_v38  ;;  %2045 = vmatpush3.xpose.msk.msra.mxu0 %vm338_vm2, %v1164_v39 }
 0x329   : > { %2054 = vmatprep.subr.mxu0 %v2428_v1 }
 0x32b   : > { %2047 = vmatmul.mubr.msk.f32.vlgmr.msra.gmra.mrb[8].mxu0 %vm338_vm2, %v1162_v33  ;;  %v589_v43 = vpop.permute.xlu0 %588 }
 0x32c   : > { %2055 = vmatpush3.xpose.msk.msra.mxu0 %vm338_vm2, %v1329_v34  ;;  %2056 = vmatprep.mubr.msk.f32.mxu0 %vm2427_vm0, %v2428_v1 }
 0x32d   : > { %2064 = vmatprep.subr.mxu0 %v2428_v1 }
 0x32f   : > { %2057 = vmatmul.mubr.msk.f32.vlgmr.msra.gmra.mrb[10].mxu0 %vm338_vm2, %v1327_v37 }
 0x330   : > { %2065 = vmatpush3.xpose.msk.msra.mxu0 %vm338_vm2, %v1494_v40  ;;  %2066 = vmatprep.mubr.msk.f32.mxu0 %vm2427_vm0, %v2428_v1 }
 0x331   : > { %2091 = vmatprep.subr.bf16.mxu0 %v2426_v0 }
 0x332   : > { %v2766_v41 = vpop.eup %2215 }
 0x333   : > { %2002 = vmatmul.mubr.msk.f32.vlgmr.msra.gmra.mrb[2].mxu1 %vm413_vm3, %v2766_v41  ;;  %2067 = vmatmul.mubr.msk.f32.vlgmr.msra.gmra.mrb[12].mxu0 %vm338_vm2, %v1492_v42 }
 0x334   : > { %2005 = vmatpush3.xpose.msk.msra.mxu1 %vm338_vm2, %v2715_v13  ;;  %2006 = vmatprep.mubr.msk.f32.mxu1 %vm2427_vm0, %v2428_v1 }
 0x335   : > { %2009 = vmatprep.subr.mxu1 %v2428_v1  ;;  %2082 = vmatprep.mubr.msk.f32.mxu0 %vm2427_vm0, %v2428_v1 }
 0x337   : > { %2007 = vmatmul.mubr.msk.f32.vlgmr.msra.gmra.mrb[4].mxu1 %vm338_vm2, %v2722_v14 }
 0x338   : > { %2010 = vmatpush3.msra.mxu1 %v589_v43  ;;  %2011 = vmatprep.mubr.msk.f32.mxu1 %vm2427_vm0, %v2428_v1 }
 0x339   : > { %2019 = vmatprep.subr.mxu1 %v2428_v1 }
 0x35c   : > { %v746_v58 = vpop.xlane.xlu0 %745 }
 0x35d   : > { %v747_v60 = vsub.f32 %v2740_v24, %v746_v58 }
 0x35f   : > { %v748_v61 = vmul.f32 1.442695, %v747_v60  ;;  %v1700_v60 = vld [vmem:[#allocation7 + $0x18] sm:$0xff] }
 0x360   : > { %v911_v59 = vpop.xlane.xlu0 %910 }
 0x361   : > { %v912_v62 = vsub.f32 %v2742_v26, %v911_v59  ;;  %2217 = vpow2.f32 %v748_v61  ;;  %v420_v26 = vsel %vm413_vm3, %v2766_v41, 0.0  ;;  %v1699_v59 = vld [vmem:[#allocation7 + $0x10] sm:$0xff] }
 0x363   : > { %v913_v2 = vmul.f32 1.442695, %v912_v62  ;;  %v2095_v62 = vpack.c.bf16 %v1700_v60, %v1699_v59 }
 0x364   : > { %v1076_v63 = vpop.xlane.xlu0 %1075 }
 0x365   : > { %v1077_v3 = vsub.f32 %v2746_v28, %v1076_v63  ;;  %2219 = vpow2.f32 %v913_v2 }
 0x367   : > { %v1078_v4 = vmul.f32 1.442695, %v1077_v3 }
 0x369   : > { %2221 = vpow2.f32 %v1078_v4 }
 0x36b   : > { %v2218_v5 = vpop.eup %2217 }
 0x36c   : > { %v750_v6 = vsel %vm413_vm3, %v2218_v5, 0.0 }
 0x36f   : > { %v2220_v7 = vpop.eup %2219 }
 0x370   : > { %v915_v8 = vsel %vm413_vm3, %v2220_v7, 0.0 }
 0x3fe   : > { %v1235_v44 = vpop.f32.mrb[8].mxu0 }
 0x3ff   : > { %v2048_v45 = vpop.f32.mrb[9].mxu0  ;;  %v1239_v46 = vsel %vm413_vm3, %v1235_v44, -inf }
 0x400   : > { %1240 = vmax.xlane.f32.xlu1 %v1239_v46 }
 0x402   : > { %v1400_v47 = vpop.f32.mrb[10].mxu0 }
 0x403   : > { %v2058_v48 = vpop.f32.mrb[11].mxu0  ;;  %v1404_v49 = vsel %vm413_vm3, %v1400_v47, -inf }
 0x404   : > { %1405 = vmax.xlane.f32.xlu0 %v1404_v49 }
 0x406   : > { %v2785_v50 = vpop.f32.mrb[2].mxu1  ;;  %v1565_v51 = vpop.f32.mrb[12].mxu0 }
 0x407   : > { %v2003_v52 = vpop.f32.mrb[3].mxu1  ;;  %v2068_v53 = vpop.f32.mrb[13].mxu0  ;;  %v1569_v54 = vsel %vm413_vm3, %v1565_v51, -inf }
 0x408   : > { %1570 = vmax.xlane.f32.xlu1 %v1569_v54  ;;  %v1698_v52 = vld [vmem:[#allocation7 + $0x8] sm:$0xff] }
 0x40a   : > { %v575_v55 = vpop.f32.mrb[4].mxu1 }
 0x40b   : > { %v2008_v56 = vpop.f32.mrb[5].mxu1  ;;  %v579_v57 = vsel %vm413_vm3, %v575_v55, -inf }
 0x40c   : > { %580 = vmax.xlane.f32.xlu1 %v579_v57 }
 0x41a   : > { %1248 = vrot.lane.b32.xlu0 %v2695_v9, %s2447_s13  ;;  %s1938_s13 = sshll.u32 %s2411_s18, 7 }
 0x41d   : > { %918 = vrot.lane.b32.xlu1 %v2695_v9, %s2448_s29  ;;  %s253_s29 = scalar_lea.vmem [#allocation8], %s1906_s8  ;;  %s2459_s8 = smov [#allocation8]  }
 0x41e   : > { %1578 = vrot.lane.b32.xlu0 %v2695_v9, %s2449_s14  ;;  %s1796_s14 = sshll.u32 %s253_s29, 4  ;;  %s2846_s14 = int_to_ptr.vmem [resolvable:$true] %s1796_s14 }
 0x41f   : > { %s2333_s18 = scalar_lea.vmem %s2846_s14, 128 }
 0x420   : > { %p2334_p8 = scmp.ne.s32.totalorder %s2846_s14, %s2333_s18 }
 0x421   : > { %1083 = vrot.lane.b32.xlu1 %v2695_v9, %s2450_s10 }
 0x422   : > { %p2335_p1 = pnand %p2334_p8, %p2913_p12 }
 0x424   : > { %p2336_p10 = pneg %p2335_p1 }
 0x425   : > { %1413 = vrot.lane.b32.xlu1 %v2695_v9, %s2451_s9  ;;  %v2222_v9 = vpop.eup %2221 }
 0x426   : > { %v1080_v10 = vsel %vm413_vm3, %v2222_v9, 0.0 }
 0x43d   : > { %751 = vadd.xlane.f32.xlu0 %v750_v6 }
 0x441   : > { %916 = vadd.xlane.f32.xlu0 %v915_v8 }
 0x445   : > { %1081 = vadd.xlane.f32.xlu0 %v1080_v10 }
 0x48d   : > { %v1241_v12 = vpop.xlane.xlu1 %1240 }
 0x48e   : > { %v1242_v17 = vsub.f32 %v1235_v44, %v1241_v12 }
 0x490   : > { %v1243_v20 = vmul.f32 1.442695, %v1242_v17 }
 0x491   : > { %v1406_v13 = vpop.xlane.xlu0 %1405 }
 0x492   : > { %v1407_v14 = vsub.f32 %v1400_v47, %v1406_v13 }
 0x494   : > { %v1408_v15 = vmul.f32 1.442695, %v1407_v14 }
 0x495   : > { %v1571_v16 = vpop.xlane.xlu1 %1570  ;;  %v1249_v35 = vpop.permute.xlu0 %1248 }
 0x496   : > { %2223 = vpow2.f32 %v1408_v15  ;;  %v1572_v21 = vsub.f32 %v1565_v51, %v1571_v16  ;;  %v1697_v51 = vld [vmem:[#allocation7] sm:$0xff] }
 0x497   : > { %v2092_v54 = vpack.c.bf16 %v1698_v52, %v1697_v51 }
 0x498   : > { %v1573_v24 = vmul.f32 1.442695, %v1572_v21 }
 0x499   : > { %v581_v18 = vpop.xlane.xlu1 %580  ;;  %v1579_v37 = vpop.permute.xlu0 %1578  ;;  %2093 = vmatpush3.bf16.msra.mxu0 %v2092_v54 }
 0x49a   : > { %v582_v19 = vsub.f32 %v575_v55, %v581_v18  ;;  %2094 = vmatprep.subr.bf16.mxu0 %v2426_v0 }
 0x49c   : > { %v583_v22 = vmul.f32 1.442695, %v582_v19 }
 0x49d   : > { %v919_v30 = vpop.permute.xlu1 %918  ;;  %2096 = vmatpush3.bf16.msra.mxu0 %v2095_v62 }
 0x49e   : > { %2225 = vpow2.f32 %v583_v22 }
 0x49f   : > { %2227 = vpow2.f32 %v1243_v20 }
 0x4a0   : > { %v2224_v23 = vpop.eup %2223  ;;  %2229 = vpow2.f32 %v1573_v24 }
 0x4a1   : > { %v1410_v25 = vsel %vm413_vm3, %v2224_v23, 0.0  ;;  %v1084_v33 = vpop.permute.xlu1 %1083 }
 0x4a2   : > { %1411 = vadd.xlane.f32.xlu0 %v1410_v25 }
 0x4a5   : > { %v1414_v36 = vpop.permute.xlu1 %1413 }
 0x4a6   : > { %421 = vadd.xlane.f32.xlu0 %v420_v26 }
 0x4a8   : > { %v2226_v27 = vpop.eup %2225 }
 0x4a9   : > { %2012 = vmatmul.mubr.msk.f32.vlgmr.msra.gmra.mrb[6].mxu1 %vm413_vm3, %v2226_v27  ;;  %v585_v28 = vsel %vm413_vm3, %v2226_v27, 0.0  ;;  %v2228_v29 = vpop.eup %2227 }
 0x4aa   : > { %2020 = vmatpush3.msra.mxu1 %v754_v11  ;;  %586 = vadd.xlane.f32.xlu1 %v585_v28  ;;  %v1245_v31 = vsel %vm413_vm3, %v2228_v29, 0.0  ;;  %v2230_v32 = vpop.eup %2229 }
 0x4ab   : > { %2021 = vmatprep.mubr.msk.f32.mxu1 %vm2427_vm0, %v2428_v1  ;;  %2029 = vmatprep.subr.mxu1 %v2428_v1  ;;  %v1575_v34 = vsel %vm413_vm3, %v2230_v32, 0.0 }
 0x4ad   : > { %2022 = vmatmul.mubr.msk.f32.vlgmr.msra.gmra.mrb[8].mxu1 %vm413_vm3, %v2218_v5 }
 0x4ae   : > { %2030 = vmatpush3.msra.mxu1 %v919_v30  ;;  %1246 = vadd.xlane.f32.xlu1 %v1245_v31 }
 0x4af   : > { %2031 = vmatprep.mubr.msk.f32.mxu1 %vm2427_vm0, %v2428_v1  ;;  %2039 = vmatprep.subr.mxu1 %v2428_v1 }
 0x4b1   : > { %2032 = vmatmul.mubr.msk.f32.vlgmr.msra.gmra.mrb[10].mxu1 %vm413_vm3, %v2220_v7 }
 0x4b2   : > { %2040 = vmatpush3.msra.mxu1 %v1084_v33  ;;  %1576 = vadd.xlane.f32.xlu1 %v1575_v34 }
 0x4b3   : > { %2041 = vmatprep.mubr.msk.f32.mxu1 %vm2427_vm0, %v2428_v1  ;;  %2049 = vmatprep.subr.mxu1 %v2428_v1 }
 0x4b5   : > { %2042 = vmatmul.mubr.msk.f32.vlgmr.msra.gmra.mrb[12].mxu1 %vm413_vm3, %v2222_v9 }
 0x4b6   : > { %2050 = vmatpush3.msra.mxu1 %v1249_v35  ;;  %2051 = vmatprep.mubr.msk.f32.mxu1 %vm2427_vm0, %v2428_v1 }
 0x4b7   : > { %2059 = vmatprep.subr.mxu1 %v2428_v1 }
 0x4b9   : > { %2052 = vmatmul.mubr.msk.f32.vlgmr.msra.gmra.mrb[14].mxu1 %vm413_vm3, %v2228_v29 }
 0x4ba   : > { %2060 = vmatpush3.msra.mxu1 %v1414_v36  ;;  %2061 = vmatprep.mubr.msk.f32.mxu1 %vm2427_vm0, %v2428_v1 }
 0x4bb   : > { %2069 = vmatprep.subr.mxu1 %v2428_v1 }
 0x4bd   : > { %2062 = vmatmul.mubr.msk.f32.vlgmr.msra.gmra.mrb[16].mxu1 %vm413_vm3, %v2224_v23 }
 0x4be   : > { %2070 = vmatpush3.msra.mxu1 %v1579_v37  ;;  %2071 = vmatprep.mubr.msk.f32.mxu1 %vm2427_vm0, %v2428_v1 }
 0x4c1   : > { %2072 = vmatmul.mubr.msk.f32.vlgmr.msra.gmra.mrb[18].mxu1 %vm413_vm3, %v2230_v32  ;;  %v1935_v32 = vld [vmem:[%s2897_s3] ss:$0 sm:$0xff] }
 0x4ca   : > { %v752_v38 = vpop.xlane.xlu0 %751 }
 0x4ce   : > { %v917_v40 = vpop.xlane.xlu0 %916 }
 0x4d2   : > { %v1082_v41 = vpop.xlane.xlu0 %1081 }
 0x52f   : > { %v1412_v53 = vpop.xlane.xlu0 %1411 }
 0x533   : > { %v422_v16 = vpop.xlane.xlu0 %421 }
 0x537   : > { %v587_v39 = vpop.xlane.xlu1 %586 }
 0x538   : > { %2231 = vrcp.f32 %v587_v39 }
 0x539   : > { %2233 = vrcp.f32 %v752_v38 }
 0x53a   : > { %2235 = vrcp.f32 %v917_v40 }
 0x53b   : > { %2237 = vrcp.f32 %v1082_v41  ;;  %v1247_v46 = vpop.xlane.xlu1 %1246 }
 0x53c   : > { %2239 = vrcp.f32 %v1247_v46 }
 0x53d   : > { %2241 = vrcp.f32 %v1412_v53 }
 0x53f   : > { %v1577_v61 = vpop.xlane.xlu1 %1576 }
 0x540   : > { %2243 = vrcp.f32 %v1577_v61 }
 0x541   : > { %2245 = vrcp.f32 %v422_v16 }
 0x542   : > { %v2232_v42 = vpop.eup %2231 }
 0x543   : > { %v2234_v47 = vpop.eup %2233 }
 0x544   : > { %v2236_v55 = vpop.eup %2235 }
 0x545   : > { %v2238_v63 = vpop.eup %2237 }
 0x546   : > { %v2240_v5 = vpop.eup %2239 }
 0x547   : > { %v2242_v0 = vpop.eup %2241 }
 0x54a   : > { %v2244_v12 = vpop.eup %2243 }
 0x54b   : > { %v2246_v19 = vpop.eup %2245 }
 0x54c   : > { %v500_v21 = vmul.f32 %v2246_v19, %v2785_v50 }
 0x57c   : > { %v660_v43 = vpop.f32.mrb[6].mxu1 }
 0x57d   : > { %v665_v44 = vmul.f32 %v2232_v42, %v660_v43  ;;  %v2013_v45 = vpop.f32.mrb[7].mxu1 }
 0x57f   : > { %1657 = vrot.lane.b32.xlu1 %v665_v44, %s2452_s11  ;;  %s2844_s11 = scalar_lea.hbm %s2898_s4, %s1938_s13 }
 0x580   : > { %v825_v48 = vpop.f32.mrb[8].mxu1 }
 0x581   : > { %v830_v1 = vmul.f32 %v2234_v47, %v825_v48  ;;  %v2023_v49 = vpop.f32.mrb[9].mxu1 }
 0x583   : > { %1661 = vrot.lane.b32.xlu0 %v830_v1, %s2453_s24  ;;  %s1783_s24 = scalar_lea.sflag [#allocation4], %s2670_s28 }
 0x584   : > { %v990_v56 = vpop.f32.mrb[10].mxu1 }
 0x585   : > { %v995_v57 = vmul.f32 %v2236_v55, %v990_v56  ;;  %v2033_v58 = vpop.f32.mrb[11].mxu1 }
 0x587   : > { %1665 = vrot.lane.b32.xlu1 %v995_v57, %s2454_s7  ;;  %s2337_s7 = sshll.u32 %s2459_s8, 4  ;;  %s2338_s7 = int_to_ptr.vmem [resolvable:$false] %s2337_s7 }
 0x588   : > { %v1155_v2 = vpop.f32.mrb[12].mxu1  ;;  %p2340_p3 = scmp.lt.s32.totalorder %s2846_s14, %s2338_s7 }
 0x589   : > { %v1160_v3 = vmul.f32 %v2238_v63, %v1155_v2  ;;  %v2043_v4 = vpop.f32.mrb[13].mxu1 }
 0x58b   : > { %1669 = vrot.lane.b32.xlu1 %v1160_v3, %s2455_s6  ;;  %s2339_s6 = scalar_lea.vmem %s2338_s7, 256 }
 0x58c   : > { %v1320_v6 = vpop.f32.mrb[14].mxu1  ;;  %p2341_p5 = scmp.lt.s32.totalorder %s2339_s6, %s2333_s18 }
 0x58d   : > { %v1325_v7 = vmul.f32 %v2240_v5, %v1320_v6  ;;  %v2053_v8 = vpop.f32.mrb[15].mxu1 }
 0x58e   : > { %p2342_p9 = por %p2341_p5, %p2340_p3 }
 0x58f   : > { %1673 = vrot.lane.b32.xlu1 %v1325_v7, %s2456_s21 }
 0x590   : > { %v1485_v9 = vpop.f32.mrb[16].mxu1  ;;  %p2343_p11 = pnand %p2342_p9, %p2336_p10 }
 0x591   : > { %v1490_v10 = vmul.f32 %v2242_v0, %v1485_v9  ;;  %v2063_v11 = vpop.f32.mrb[17].mxu1 }
 0x593   : > { %1677 = vrot.lane.b32.xlu0 %v1490_v10, %s2457_s23 }
 0x594   : > { %v1650_v13 = vpop.f32.mrb[18].mxu1 }
 0x595   : > { %v1655_v14 = vmul.f32 %v2244_v12, %v1650_v13  ;;  %v2073_v15 = vpop.f32.mrb[19].mxu1 }
 0x597   : > { %1681 = vrot.lane.b32.xlu1 %v1655_v14, %s2458_s25 }
 0x5f1   : > { %v1658_v17 = vpop.permute.xlu1 %1657 }
 0x5f2   : > { %v1684_v23 = vsel %vm338_vm2, %v500_v21, %v1658_v17 }
 0x5f5   : > { %v1662_v22 = vpop.permute.xlu0 %1661 }
 0x5f6   : > { %v1685_v24 = vsel %vm413_vm3, %v1684_v23, %v1662_v22 }
 0x5f9   : > { %v1666_v18 = vpop.permute.xlu1 %1665 }
 0x5fa   : > { %v1687_v26 = vsel %vm1686_vm4, %v1685_v24, %v1666_v18 }
 0x5fd   : > { %v1670_v20 = vpop.permute.xlu1 %1669 }
 0x5fe   : > { %v1689_v28 = vsel %vm1688_vm5, %v1687_v26, %v1670_v20 }
 0x601   : > { %v1674_v25 = vpop.permute.xlu1 %1673 }
 0x602   : > { %v1691_v29 = vsel %vm1690_vm6, %v1689_v28, %v1674_v25 }
 0x605   : > { %v1678_v27 = vpop.permute.xlu0 %1677 }
 0x606   : > { %v1693_v30 = vsel %vm1692_vm7, %v1691_v29, %v1678_v27 }
 0x609   : > { %v1682_v50 = vpop.permute.xlu1 %1681 }
 0x60a   : > { %v1695_v31 = vsel %vm1694_vm8, %v1693_v30, %v1682_v50 }
 0x60b   : > { %2083 = vmatmul.mubr.msk.f32.vlgmr.msra.gmra.mrb[14].mxu0 %vm261_vm1, %v1695_v31 }
 0x6de   : > { %v1777_v33 = vpop.f32.mrb[14].mxu0 }
 0x6df   : > { %v1778_v34 = vadd.f32 %v1935_v32, %v1777_v33  ;;  %v2084_v35 = vpop.f32.mrb[15].mxu0 }
 0x6e1   : > { %1781 = vst.msk [vmem:[%s253_s29] sm:$0xff] %vm261_vm1, %v1778_v34 }
 0x6e2   : > { %2346 = shalt.err (!%p2343_p11)
}
 0x6e3   : > { %s2347_s28 = scalar_lea.hbm %s2844_s11, 128  ;;  %s2351_s25 = scalar_lea.hbm %s2898_s4, 256 }
 0x6e4   : > { %p2348_p0 = scmp.ne.s32.totalorder %s2844_s11, %s2347_s28  ;;  %p2352_p6 = scmp.lt.u32.totalorder %s2844_s11, %s2898_s4 }
 0x6e5   : > { %p2353_p7 = scmp.lt.u32.totalorder %s2351_s25, %s2347_s28  ;;  %p2355_p8 = scmp.lt.u32.totalorder %s2347_s28, %s2844_s11 }
 0x6e6   : > { %p2349_p4 = pnand %p2348_p0, %p2913_p12 }
 0x6e7   : > { %p2354_p2 = por %p2353_p7, %p2352_p6 }
 0x6e8   : > { %p2350_p13 = pneg %p2349_p4 }
 0x6e9   : > { %p2356_p1 = por %p2355_p8, %p2354_p2 }
 0x6eb   : > { %p2357_p10 = pnand %p2356_p1, %p2350_p13 }
 0x6ed   : > { %2360 = shalt.err (!%p2357_p10)
}
 0x6ee   : > { %2107 = dma.vmem_to_hbm [thread:$0]  (%p2913_p12), %s2846_s14, 128, %s2844_s11, %s1783_s24  }
 0x6ef PF: > { %s1808_s13 = sand.u32 1, %s2399_s15   ;;  %p2914_p3 = scmp.ne.s32.totalorder %s2906_s26, 0 }
 0x6f0   : > { %p2915_p5 = scmp.ge.s32.totalorder %s2419_s20, 2  ;;  %s1809_s29 = scalar_lea.sflag [#allocation4], %s1808_s13 }
 0x6f2   : > { %p2121_p9 = pnand %p2915_p5, %p2914_p3 }
 0x6f4   : > { %2394 = dma.done.wait (!%p2121_p9), %s1809_s29, 128  }
 0x6f5   : > { %2396 = vsyncadd (!%p2121_p9), %s1809_s29, 4294967168  ;;  %s21_s20 = sadd.s32 1, %s2419_s20   ;;  %s2916_s15 = smov %s2403_s16 }
 0x6f6   : > { %p18_p11 = scmp.ge.s32.totalorder %s21_s20, 4   ;;  %s2917_s16 = smov %s2407_s17 }
 0x6f7   : > { %s2918_s17 = smov %s2627_s22  ;;  %s2919_s18 = smov %s2415_s19 }
 0x6f8   : > { %s2920_s19 = smov %s2922_s5  ;;  %20 = sbr.rel (!%p18_p11) target bundleno = 7 (0x7), region = 91 }
 0x6ff   :  { %1814 = vsyncpa [#allocation3], 1 }
 0x700   :  { %1816 = vsyncpa [#allocation3 + $0x1], 1 }
 0x701   :  { %1817 = vsyncpa [#allocation6], 1 }
 0x702   :  { %1818 = vsyncpa [#allocation4], 1 }
 0x703   :  { %1820 = vsyncpa [#allocation4 + $0x1], 1 }

</bundles_post_ra>
